<compile_context>
chip_gen: v7x
topology: tpu7x:2x2x1
jax: 0.10.0
libtpu: 0.0.40
codegen_flags: <defaults>
</compile_context>

<pallas_src>
import functools

import jax
import jax.numpy as jnp
from jax import lax
from jax.experimental import pallas as pl
from jax.experimental.pallas import tpu as pltpu


# ---------------------------------------------------------------------------
# Kernel 1: fused  Linear(in->H) (+ dropout identity) + rnn1 input projection.
#   x(T*B, D) -> proj = x @ W_lin + b_lin
#             -> gates = proj @ [W_ih1_fwd | W_ih1_bwd] + [b1_fwd | b1_bwd]
#   emitted as two (T*B, 4H) tensors (forward / backward input gates).
# ---------------------------------------------------------------------------
def _lin_proj1_kernel(x_ref, wlin_ref, blin_ref, wih_ref, bih_ref,
                      gf_ref, gb_ref, *, H):
    x = x_ref[...].astype(jnp.bfloat16)
    proj = jnp.dot(x, wlin_ref[...], preferred_element_type=jnp.float32)
    proj = proj + blin_ref[...]
    # dropout: identity in eval-mode forward
    g = jnp.dot(proj.astype(jnp.bfloat16), wih_ref[...],
                preferred_element_type=jnp.float32) + bih_ref[...]
    gf_ref[...] = g[:, :4 * H]
    gb_ref[...] = g[:, 4 * H:]


def lin_proj1(x2d, w_lin, b_lin, w_ih, b_ih, *, H):
    N = x2d.shape[0]
    return pl.pallas_call(
        functools.partial(_lin_proj1_kernel, H=H),
        out_shape=[jax.ShapeDtypeStruct((N, 4 * H), jnp.float32),
                   jax.ShapeDtypeStruct((N, 4 * H), jnp.float32)],
    )(x2d, w_lin, b_lin, w_ih, b_ih)


# ---------------------------------------------------------------------------
# Kernel 2: fused  LayerNorm(2H)  +  rnn2 input projection (both directions).
# ---------------------------------------------------------------------------
def _ln_proj2_kernel(hf_ref, hb_ref, gamma_ref, beta_ref, wih_ref, bih_ref,
                     gf_ref, gb_ref, *, H):
    h = jnp.concatenate([hf_ref[...], hb_ref[...]], axis=-1)      # (N, 2H) f32
    mu = jnp.mean(h, axis=-1, keepdims=True)
    var = jnp.mean((h - mu) ** 2, axis=-1, keepdims=True)
    normed = (h - mu) * lax.rsqrt(var + 1e-5) * gamma_ref[...] + beta_ref[...]
    g = jnp.dot(normed.astype(jnp.bfloat16), wih_ref[...],
                preferred_element_type=jnp.float32) + bih_ref[...]
    gf_ref[...] = g[:, :4 * H]
    gb_ref[...] = g[:, 4 * H:]


def ln_proj2(hf2d, hb2d, gamma, beta, w_ih, b_ih, *, H):
    N = hf2d.shape[0]
    return pl.pallas_call(
        functools.partial(_ln_proj2_kernel, H=H),
        out_shape=[jax.ShapeDtypeStruct((N, 4 * H), jnp.float32),
                   jax.ShapeDtypeStruct((N, 4 * H), jnp.float32)],
    )(hf2d, hb2d, gamma, beta, w_ih, b_ih)


# ---------------------------------------------------------------------------
# Kernel 3: fused bidirectional LSTM recurrence over time (grid = (T,)).
#   Per step: only the hidden-state matmul (the input projection is already
#   folded into the precomputed gates).  dir 0 = forward (time t),
#   dir 1 = backward (time T-1-t).  Length masking via jnp.where select.
# ---------------------------------------------------------------------------
def _bilstm_kernel(mf_ref, mb_ref, gf_ref, gb_ref, whh_ref, *refs,
                   H, with_seq):
    if with_seq:
        hseqf_ref, hseqb_ref, hfin_ref, h_sc, c_sc = refs
    else:
        hfin_ref, h_sc, c_sc = refs

    @pl.when(pl.program_id(0) == 0)
    def _():
        h_sc[...] = jnp.zeros_like(h_sc)
        c_sc[...] = jnp.zeros_like(c_sc)

    h_prev = h_sc[...]                                            # (2, B, H)
    c_prev = c_sc[...]

    # precomputed input gates, PyTorch [i, f, g, o] layout
    pre = jnp.concatenate([gf_ref[...], gb_ref[...]], axis=0)     # (2, B, 4H)
    hh = jnp.einsum('dbh,dhg->dbg',
                    h_prev.astype(jnp.bfloat16), whh_ref[...],
                    preferred_element_type=jnp.float32)           # (2, B, 4H)
    gates = pre + hh

    i_g = jax.nn.sigmoid(gates[..., 0 * H:1 * H])
    f_g = jax.nn.sigmoid(gates[..., 1 * H:2 * H])
    g_g = jnp.tanh(gates[..., 2 * H:3 * H])
    o_g = jax.nn.sigmoid(gates[..., 3 * H:4 * H])

    c_new = f_g * c_prev + i_g * g_g
    h_new = o_g * jnp.tanh(c_new)

    valid = jnp.concatenate([mf_ref[...], mb_ref[...]], axis=0) > 0.5  # (2,B,1)
    h_upd = jnp.where(valid, h_new, h_prev)
    c_upd = jnp.where(valid, c_new, c_prev)
    h_sc[...] = h_upd
    c_sc[...] = c_upd
    hfin_ref[...] = h_upd           # resident output: last write == final state

    if with_seq:
        # zeros on padded steps -> matches pad_packed_sequence exactly
        h_out = jnp.where(valid, h_new, 0.0)
        hseqf_ref[...] = h_out[0:1]
        hseqb_ref[...] = h_out[1:2]


def bilstm(gates_f, gates_b, mask, w_hh, *, with_seq):
    """gates_f/gates_b: (T,B,4H) f32, mask: (T,B,1) f32, w_hh: (2,H,4H) bf16."""
    T, B, G = gates_f.shape
    H = G // 4
    fwd = lambda t: (t, 0, 0)
    bwd = lambda t: (T - 1 - t, 0, 0)
    const = lambda t: (0, 0, 0)

    out_shape, out_specs = [], []
    if with_seq:
        out_shape += [jax.ShapeDtypeStruct((T, B, H), jnp.float32),
                      jax.ShapeDtypeStruct((T, B, H), jnp.float32)]
        out_specs += [pl.BlockSpec((1, B, H), fwd),
                      pl.BlockSpec((1, B, H), bwd)]
    out_shape += [jax.ShapeDtypeStruct((2, B, H), jnp.float32)]
    out_specs += [pl.BlockSpec((2, B, H), const)]

    res = pl.pallas_call(
        functools.partial(_bilstm_kernel, H=H, with_seq=with_seq),
        grid=(T,),
        in_specs=[
            pl.BlockSpec((1, B, 1), fwd),          # validity mask, forward time
            pl.BlockSpec((1, B, 1), bwd),          # validity mask, reverse time
            pl.BlockSpec((1, B, 4 * H), fwd),      # precomputed gates, fwd dir
            pl.BlockSpec((1, B, 4 * H), bwd),      # precomputed gates, bwd dir
            pl.BlockSpec((2, H, 4 * H), const),    # W_hh (both dirs), bf16
        ],
        out_specs=out_specs,
        out_shape=out_shape,
        scratch_shapes=[pltpu.VMEM((2, B, H), jnp.float32),   # h (fwd, bwd)
                        pltpu.VMEM((2, B, H), jnp.float32)],  # c (fwd, bwd)
        compiler_params=pltpu.CompilerParams(
            dimension_semantics=("arbitrary",),    # serial time recurrence
            vmem_limit_bytes=64 * 1024 * 1024),
    )(mask, mask, gates_f, gates_b, w_hh)
    if with_seq:
        return res[0], res[1], res[2]
    return res[0]


# ------------------------------ AVsubNet glue -------------------------------
def init_params(key, in_size, hidden):
    H = hidden
    keys = jax.random.split(key, 24)
    kit = iter(keys)

    def u(shape, fan_in):
        bound = 1.0 / jnp.sqrt(jnp.float32(fan_in))
        return jax.random.uniform(next(kit), shape, jnp.float32, -bound, bound)

    p = {"hidden": H}
    # nn.Linear(in_size, hidden)
    p["w_lin"] = u((in_size, H), in_size).astype(jnp.bfloat16)
    p["b_lin"] = u((1, H), in_size)
    # rnn1: LSTM(H, H, bidirectional). Gate order [i,f,g,o]; the two PyTorch
    # biases (b_ih + b_hh) are merged (two independent draws summed).
    p["w_ih1"] = jnp.concatenate([u((H, 4 * H), H), u((H, 4 * H), H)],
                                 axis=1).astype(jnp.bfloat16)            # (H, 8H)
    p["w_hh1"] = jnp.stack([u((H, 4 * H), H), u((H, 4 * H), H)],
                           axis=0).astype(jnp.bfloat16)                  # (2,H,4H)
    p["b1"] = jnp.concatenate([u((1, 4 * H), H) + u((1, 4 * H), H),
                               u((1, 4 * H), H) + u((1, 4 * H), H)], axis=1)
    # LayerNorm(2H)
    p["ln_g"] = jnp.ones((1, 2 * H), jnp.float32)
    p["ln_b"] = jnp.zeros((1, 2 * H), jnp.float32)
    # rnn2: LSTM(2H, H, bidirectional)
    p["w_ih2"] = jnp.concatenate([u((2 * H, 4 * H), H), u((2 * H, 4 * H), H)],
                                 axis=1).astype(jnp.bfloat16)            # (2H, 8H)
    p["w_hh2"] = jnp.stack([u((H, 4 * H), H), u((H, 4 * H), H)],
                           axis=0).astype(jnp.bfloat16)
    p["b2"] = jnp.concatenate([u((1, 4 * H), H) + u((1, 4 * H), H),
                               u((1, 4 * H), H) + u((1, 4 * H), H)], axis=1)
    return p


def avsubnet_forward(params, sequence, lengths):
    # sequence: (B, T, D_in), lengths: (B,) valid lengths
    B, T, D = sequence.shape
    H = params["hidden"]
    lengths = lengths.reshape(-1).astype(jnp.int32)

    # one-time transpose to time-major; projection matmuls then see contiguous
    # (T*B, D) rows and their outputs reshape to (T, B, 4H) for free.
    x_tm = jnp.transpose(sequence.astype(jnp.float32), (1, 0, 2)).reshape(T * B, D)
    mask = (jnp.arange(T, dtype=jnp.int32)[:, None] < lengths[None, :]
            ).astype(jnp.float32).reshape(T, B, 1)

    # Fused Linear (+dropout identity) + rnn1 input projection (all timesteps,
    # both directions) as one big MXU matmul pair.
    g1f, g1b = lin_proj1(x_tm, params["w_lin"], params["b_lin"],
                         params["w_ih1"], params["b1"], H=H)
    g1f = g1f.reshape(T, B, 4 * H)
    g1b = g1b.reshape(T, B, 4 * H)

    # rnn1: fused bidirectional recurrence (the full hidden sequence is needed).
    h1f_seq, h1b_seq, h1_fin = bilstm(g1f, g1b, mask, params["w_hh1"],
                                      with_seq=True)

    # Fused LayerNorm + rnn2 input projection.
    g2f, g2b = ln_proj2(h1f_seq.reshape(T * B, H), h1b_seq.reshape(T * B, H),
                        params["ln_g"], params["ln_b"],
                        params["w_ih2"], params["b2"], H=H)
    g2f = g2f.reshape(T, B, 4 * H)
    g2b = g2b.reshape(T, B, 4 * H)

    # rnn2: only the final hidden states are needed.
    h2_fin = bilstm(g2f, g2b, mask, params["w_hh2"], with_seq=False)

    # torch.cat((final_h1, final_h2), dim=2).permute(1,0,2).view(B, -1)
    #   => per batch row: [h1_fwd, h2_fwd, h1_bwd, h2_bwd]
    return jnp.concatenate([h1_fin[0], h2_fin[0], h1_fin[1], h2_fin[1]], axis=-1)


# -------------------- pure-JAX reference (same numerics) --------------------
def _bdot(a, b):
    return jnp.dot(a.astype(jnp.bfloat16), b.astype(jnp.bfloat16),
                   preferred_element_type=jnp.float32)


def reference_forward(params, sequence, lengths):
    """lax.scan reference mirroring the kernels' bf16-matmul / f32-math split."""
    B, T, D = sequence.shape
    H = params["hidden"]
    lengths = lengths.reshape(-1).astype(jnp.int32)

    x_tm = jnp.transpose(sequence.astype(jnp.float32), (1, 0, 2))      # (T,B,D)
    valid = (jnp.arange(T)[:, None] < lengths[None, :])[..., None]     # (T,B,1)

    proj = _bdot(x_tm.reshape(T * B, D), params["w_lin"]) + params["b_lin"]
    g1 = (_bdot(proj, params["w_ih1"]) + params["b1"]).reshape(T, B, 8 * H)

    def run_dir(pre, w_hh, reverse):
        pre_o = pre[::-1] if reverse else pre
        val_o = valid[::-1] if reverse else valid

        def step(carry, inp):
            h, c = carry
            g_t, v = inp
            gates = g_t + _bdot(h, w_hh)
            i = jax.nn.sigmoid(gates[:, 0 * H:1 * H])
            f = jax.nn.sigmoid(gates[:, 1 * H:2 * H])
            g = jnp.tanh(gates[:, 2 * H:3 * H])
            o = jax.nn.sigmoid(gates[:, 3 * H:4 * H])
            c_new = f * c + i * g
            h_new = o * jnp.tanh(c_new)
            return ((jnp.where(v, h_new, h), jnp.where(v, c_new, c)),
                    jnp.where(v, h_new, 0.0))

        z = jnp.zeros((B, H), jnp.float32)
        (h_fin, _), outs = lax.scan(step, (z, z), (pre_o, val_o))
        return (outs[::-1] if reverse else outs), h_fin

    h1f_seq, h1f_fin = run_dir(g1[..., :4 * H], params["w_hh1"][0], False)
    h1b_seq, h1b_fin = run_dir(g1[..., 4 * H:], params["w_hh1"][1], True)

    h1 = jnp.concatenate([h1f_seq, h1b_seq], axis=-1).reshape(T * B, 2 * H)
    mu = jnp.mean(h1, axis=-1, keepdims=True)
    var = jnp.mean((h1 - mu) ** 2, axis=-1, keepdims=True)
    normed = (h1 - mu) * lax.rsqrt(var + 1e-5) * params["ln_g"] + params["ln_b"]
    g2 = (_bdot(normed, params["w_ih2"]) + params["b2"]).reshape(T, B, 8 * H)

    _, h2f_fin = run_dir(g2[..., :4 * H], params["w_hh2"][0], False)
    _, h2b_fin = run_dir(g2[..., 4 * H:], params["w_hh2"][1], True)
    return jnp.concatenate([h1f_fin, h2f_fin, h1b_fin, h2b_fin], axis=-1)


if __name__ == "__main__":
    key = jax.random.PRNGKey(0)
    B, T, D_in, H = 2, 8, 16, 32
    k_x, k_p = jax.random.split(key)
    sequence = jax.random.normal(k_x, (B, T, D_in), jnp.float32)
    lengths = jnp.array([8, 5], dtype=jnp.int32)   # variable valid lengths
    params = init_params(k_p, D_in, H)

    out = jax.block_until_ready(avsubnet_forward(params, sequence, lengths))
    assert out.shape == (B, 4 * H), out.shape
    assert bool(jnp.all(jnp.isfinite(out)))

    ref = jax.block_until_ready(reference_forward(params, sequence, lengths))
    max_err = float(jnp.max(jnp.abs(out - ref)))
    assert max_err < 2e-2, f"mismatch vs pure-JAX reference: {max_err}"
    print("KERNEL_OK")
</pallas_src>

<mosaic_0001>
module attributes {stable_mosaic.version = 11 : i64} {
  func.func @_lin_proj1_kernel(%arg0: memref<16x16xf32, #tpu.memory_space<vmem>>, %arg1: memref<16x32xbf16, #tpu.memory_space<vmem>>, %arg2: memref<1x32xf32, #tpu.memory_space<vmem>>, %arg3: memref<32x256xbf16, #tpu.memory_space<vmem>>, %arg4: memref<1x256xf32, #tpu.memory_space<vmem>>, %arg5: memref<16x128xf32, #tpu.memory_space<vmem>>, %arg6: memref<16x128xf32, #tpu.memory_space<vmem>>) attributes {dimension_semantics = [], scalar_prefetch = 0 : i64, scratch_operands = 0 : i64, tpu.core_type = #tpu.core_type<tc>} {
    %c0 = arith.constant 0 : index
    %c0_0 = arith.constant 0 : index
    %0 = vector.load %arg0[%c0, %c0_0] : memref<16x16xf32, #tpu.memory_space<vmem>>, vector<16x16xf32>
    %1 = arith.truncf %0 : vector<16x16xf32> to vector<16x16xbf16>
    %c0_1 = arith.constant 0 : index
    %c0_2 = arith.constant 0 : index
    %2 = vector.load %arg1[%c0_1, %c0_2] : memref<16x32xbf16, #tpu.memory_space<vmem>>, vector<16x32xbf16>
    %cst = arith.constant dense<0.000000e+00> : vector<16x32xf32>
    %3 = tpu.matmul %1, %2, %cst {dimension_numbers = #tpu.dot_dimension_numbers<[1], [0], [0], [1], [0, 0, 1, 1], [], []>} : vector<16x16xbf16>, vector<16x32xbf16>, vector<16x32xf32> -> vector<16x32xf32>
    %c0_3 = arith.constant 0 : index
    %c0_4 = arith.constant 0 : index
    %4 = vector.load %arg2[%c0_3, %c0_4] : memref<1x32xf32, #tpu.memory_space<vmem>>, vector<1x32xf32>
    %5 = vector.broadcast %4 : vector<1x32xf32> to vector<16x32xf32>
    %6 = arith.addf %3, %5 : vector<16x32xf32>
    %7 = arith.truncf %6 : vector<16x32xf32> to vector<16x32xbf16>
    %c0_5 = arith.constant 0 : index
    %c0_6 = arith.constant 0 : index
    %8 = vector.load %arg3[%c0_5, %c0_6] : memref<32x256xbf16, #tpu.memory_space<vmem>>, vector<32x256xbf16>
    %cst_7 = arith.constant dense<0.000000e+00> : vector<16x256xf32>
    %9 = tpu.matmul %7, %8, %cst_7 {dimension_numbers = #tpu.dot_dimension_numbers<[1], [0], [0], [1], [0, 0, 1, 1], [], []>} : vector<16x32xbf16>, vector<32x256xbf16>, vector<16x256xf32> -> vector<16x256xf32>
    %c0_8 = arith.constant 0 : index
    %c0_9 = arith.constant 0 : index
    %10 = vector.load %arg4[%c0_8, %c0_9] : memref<1x256xf32, #tpu.memory_space<vmem>>, vector<1x256xf32>
    %11 = vector.broadcast %10 : vector<1x256xf32> to vector<16x256xf32>
    %12 = arith.addf %9, %11 : vector<16x256xf32>
    %13 = vector.extract_strided_slice %12 {offsets = [0, 0], sizes = [16, 128], strides = [1, 1]} : vector<16x256xf32> to vector<16x128xf32>
    %c0_10 = arith.constant 0 : index
    %c0_11 = arith.constant 0 : index
    %14 = vector.load %arg5[%c0_10, %c0_11] : memref<16x128xf32, #tpu.memory_space<vmem>>, vector<16x128xf32>
    tpu.vector_store %arg5[%c0_10, %c0_11], %13 {strides = array<i32>} : memref<16x128xf32, #tpu.memory_space<vmem>>, vector<16x128xf32>,
    %15 = vector.extract_strided_slice %12 {offsets = [0, 128], sizes = [16, 128], strides = [1, 1]} : vector<16x256xf32> to vector<16x128xf32>
    %c0_12 = arith.constant 0 : index
    %c0_13 = arith.constant 0 : index
    %16 = vector.load %arg6[%c0_12, %c0_13] : memref<16x128xf32, #tpu.memory_space<vmem>>, vector<16x128xf32>
    tpu.vector_store %arg6[%c0_12, %c0_13], %15 {strides = array<i32>} : memref<16x128xf32, #tpu.memory_space<vmem>>, vector<16x128xf32>,
    return
  }
}

</mosaic_0001>

<bundles_post_ra>
// kernel: tpu_custom_call.1
= control target key start
LH: loop header
LB: loop body
LE: loop exit
PB: predicated region body
PF: predicated region fallthrough
CT: control target
= control target key end

     0   :  { %12 = vsyncpa [#allocation3], 0  ;;  %s536_s0 = inlined_call_operand.hbm [shape: f32[16,16], index: 0, kind: input, shape index: {}]   ;;  %s537_s1 = inlined_call_operand.hbm [shape: bf16[16,32], index: 1, kind: input, shape index: {}]   ;;  %s538_s2 = inlined_call_operand.vmem [shape: f32[1,32], index: 2, kind: input, shape index: {}]   ;;  %s539_s3 = inlined_call_operand.hbm [shape: bf16[32,256], index: 3, kind: input, shape index: {}]   ;;  %s540_s4 = inlined_call_operand.vmem [shape: f32[1,256], index: 4, kind: input, shape index: {}]   ;;  %s541_s5 = inlined_call_operand.hbm [shape: f32[16,128], index: 5, kind: output, shape index: {0}]   ;;  %s542_s6 = inlined_call_operand.hbm [shape: f32[16,128], index: 6, kind: output, shape index: {1}]  }
   0x1   :  { %13 = vsyncpa [#allocation6], 0 }
   0x2   :  { %14 = vsyncpa [#allocation4], 0 }
   0x3   :  { %15 = vsyncpa [#allocation10], 0  ;;  %s404_s21 = smov [#allocation5]   ;;  %s286_s25 = scalar_lea.hbm %s537_s1, 128 }
   0x4   :  { %s33_s22 = sshll.u32 %s404_s21, 4  ;;  %p287_p0 = scmp.ne.s32.totalorder %s537_s1, %s286_s25  ;;  %s34_s22 = int_to_ptr.vmem [resolvable:$true] %s33_s22 }
   0x5   :  { %p290_p1 = scmp.lt.u32.totalorder %s286_s25, %s537_s1 }
   0x7   :  { %p292_p2 = pnand %p290_p1, %p287_p0 }
   0x9   :  { %295 = shalt.err (!%p292_p2)
}
   0xa   :  { %s296_s30 = scalar_lea.vmem %s34_s22, 128  ;;  %p301_p4 = scmp.lt.s32.totalorder %s34_s22, %s34_s22 }
   0xb   :  { %p297_p3 = scmp.ne.s32.totalorder %s34_s22, %s296_s30  ;;  %p302_p5 = scmp.lt.s32.totalorder %s296_s30, %s296_s30 }
   0xd   :  { %p303_p6 = por %p302_p5, %p301_p4 }
   0xf   :  { %p304_p7 = pnand %p303_p6, %p297_p3 }
  0x11   :  { %307 = shalt.err (!%p304_p7)
}
  0x12   :  { %s405_s7 = smov 64   ;;  %s406_s8 = smov 4  }
  0x13   :  { %39 = dma.hbm_to_vmem [thread:$0]  %s537_s1, 128, %s34_s22, [#allocation6], %s405_s7, %s405_s7, %s406_s8  }
  0x14   :  { %s407_s11 = smov [#allocation2]   ;;  %s308_s15 = scalar_lea.hbm %s536_s0, 256 }
  0x15   :  { %s21_s12 = sshll.u32 %s407_s11, 4  ;;  %p309_p8 = scmp.ne.s32.totalorder %s536_s0, %s308_s15  ;;  %s22_s12 = int_to_ptr.vmem [resolvable:$true] %s21_s12 }
  0x16   :  { %p312_p9 = scmp.lt.u32.totalorder %s308_s15, %s536_s0 }
  0x18   :  { %p314_p10 = pnand %p312_p9, %p309_p8 }
  0x1a   :  { %317 = shalt.err (!%p314_p10)
}
  0x1b   :  { %s318_s20 = scalar_lea.vmem %s22_s12, 256  ;;  %p323_p12 = scmp.lt.s32.totalorder %s22_s12, %s22_s12 }
  0x1c   :  { %p319_p11 = scmp.ne.s32.totalorder %s22_s12, %s318_s20  ;;  %p324_p13 = scmp.lt.s32.totalorder %s318_s20, %s318_s20 }
  0x1e   :  { %p325_p0 = por %p324_p13, %p323_p12 }
  0x20   :  { %p326_p1 = pnand %p325_p0, %p319_p11 }
  0x22   :  { %329 = shalt.err (!%p326_p1)
}
  0x23   :  { %s408_s1 = smov 128   ;;  %s409_s21 = smov 8  }
  0x24   :  { %27 = dma.hbm_to_vmem [thread:$0]  %s536_s0, 256, %s22_s12, [#allocation3], %s408_s1, %s408_s1, %s409_s21  }
  0x25   :  { %s410_s24 = smov [#allocation7]   ;;  %s330_s28 = scalar_lea.hbm %s539_s3, 512 }
  0x26   :  { %s47_s25 = sshll.u32 %s410_s24, 4  ;;  %p331_p2 = scmp.ne.s32.totalorder %s539_s3, %s330_s28  ;;  %s48_s25 = int_to_ptr.vmem [resolvable:$true] %s47_s25 }
  0x27   :  { %p334_p3 = scmp.lt.u32.totalorder %s330_s28, %s539_s3 }
  0x29   :  { %p336_p4 = pnand %p334_p3, %p331_p2 }
  0x2b   :  { %339 = shalt.err (!%p336_p4)
}
  0x2c   :  { %s340_s9 = scalar_lea.vmem %s48_s25, 512  ;;  %p345_p6 = scmp.lt.s32.totalorder %s48_s25, %s48_s25 }
  0x2d   :  { %p341_p5 = scmp.ne.s32.totalorder %s48_s25, %s340_s9  ;;  %p346_p7 = scmp.lt.s32.totalorder %s340_s9, %s340_s9 }
  0x2f   :  { %p347_p8 = por %p346_p7, %p345_p6 }
  0x31   :  { %p348_p9 = pnand %p347_p8, %p341_p5 }
  0x33   :  { %351 = shalt.err (!%p348_p9)
}
  0x34   :  { %53 = dma.hbm_to_vmem [thread:$0]  %s539_s3, 512, %s48_s25, [#allocation6], %s408_s1, %s408_s1, %s409_s21  }
  0x35   :  { %396 = dma.done.wait [#allocation3], 256  }
  0x36   :  { %397 = vsyncadd [#allocation3], 4294967040 }
  0x37   :  { %398 = dma.done.wait [#allocation6], 640  }
  0x38   :  { %399 = vsyncadd [#allocation6], 4294966656  ;;  %v411_v0 = vmov 0.0   ;;  %vm412_vm0 = vmmov 0   ;;  %v279_v1 = vld [vmem:[#allocation5] sm:$0xff]   ;;  %v66_v2 = vld [vmem:[#allocation2] sm:$0xff]  ;;  %v136_v18 = vlaneseq }
  0x39   :  { %261 = vmatprep.subr.bf16.mxu0 %v411_v0  ;;  %263 = vmatprep.mubr.msk.bf16.mxu0 %vm412_vm0, %v411_v0  ;;  %v67_v3 = vld [vmem:[#allocation2 + $0x8] sm:$0xff]  ;;  %vm84_vm1 = vcmask 130048   ;;  %v280_v5 = vld [vmem:[#allocation7 + $0x4] ss:$8 sps:$4 sm:$0xff]   ;;  %v282_v6 = vld [vmem:[#allocation7] ss:$8 sps:$4 sm:$0xff]  }
  0x3a   :  { %262 = vmatpush3.bf16.msra.mxu0 %v279_v1  ;;  %v68_v4 = vpack.c.bf16 %v67_v3, %v66_v2  ;;  %170 = vmatprep.subr.bf16.mxu1 %v280_v5  ;;  %v283_v7 = vld [vmem:[#allocation7 + $0x14] ss:$8 sps:$4 sm:$0xff]   ;;  %v285_v8 = vld [vmem:[#allocation7 + $0x10] ss:$8 sps:$4 sm:$0xff]   ;;  %v413_v9 = vmov 0   ;;  %vm166_vm2 = vcmask 261120  }
  0x3b   :  { %171 = vmatpush1.bf16.msra.mxu1 %v282_v6  ;;  %202 = vmatprep.mubr.bf16.mxu1 %v413_v9  ;;  %v251_v10 = vld [vmem:[%s538_s2] ss:$0 sm:$0xff]  ;;  %v137_v19 = vshrl.u32 %v136_v18, 7  ;;  %s414_s2 = smov [#allocation8]   ;;  %s415_s15 = smov [#allocation9]  }
  0x3c   :  { %172 = vmatprep.subr.bf16.mxu1 %v283_v7  ;;  %v134_v21 = vld [vmem:[%s540_s4] sm:$0x3]  ;;  %s222_s14 = sshll.u32 %s414_s2, 4  ;;  %s234_s16 = sshll.u32 %s415_s15, 4  ;;  %s223_s14 = int_to_ptr.vmem [resolvable:$true] %s222_s14  ;;  %s499_s16 = int_to_ptr.vmem [resolvable:$true] %s234_s16 }
  0x3d   :  { %264 = vmatmul.mubr.msk.bf16.vlgmr.msra.gmra.mrb[0].mxu0 %vm84_vm1, %v68_v4  ;;  %v138_v20 = vsub.s32 0, %v137_v19  ;;  %v142_v22 = vsub.s32 1, %v137_v19  ;;  %s352_s4 = scalar_lea.vmem %s223_s14, 256  ;;  %p357_p11 = scmp.lt.s32.totalorder %s223_s14, %s223_s14 }
  0x3e   :  { %p353_p10 = scmp.ne.s32.totalorder %s223_s14, %s352_s4  ;;  %p358_p12 = scmp.lt.s32.totalorder %s352_s4, %s352_s4 }
  0x3f   :  { %173 = vmatpush1.bf16.msra.mxu1 %v285_v8  ;;  %v139_v23 = vrot.slane %v134_v21, %v138_v20  ;;  %v143_v24 = vrot.slane %v134_v21, %v142_v22 }
  0x40   :  { %p359_p13 = por %p358_p12, %p357_p11 }
  0x42   :  { %p360_p0 = pnand %p359_p13, %p353_p10 }
 0x110   :  { %v122_v11 = vpop.f32.mrb[0].mxu0 }
 0x111   :  { %v265_v12 = vpop.f32.mrb[1].mxu0  ;;  %v123_v14 = vadd.f32 %v251_v10, %v122_v11 }
 0x112   :  { %v125_v13 = vpop.f32.mrb[2].mxu0 }
 0x113   :  { %v126_v15 = vadd.f32 %v251_v10, %v125_v13  ;;  %v266_v16 = vpop.f32.mrb[3].mxu0 }
 0x115   :  { %v129_v17 = vpack.c.bf16 %v126_v15, %v123_v14 }
 0x117   :  { %258 = vmatmul.mubr.msk.bf16.vlgmr.msra.gmra.mrb[0].mxu1 %vm166_vm2, %v129_v17 }
 0x1ea   :  { %v204_v25 = vpop.f32.mrb[0].mxu1 }
 0x1eb   :  { %v205_v26 = vadd.f32 %v204_v25, %v139_v23  ;;  %v206_v27 = vpop.f32.mrb[1].mxu1 }
 0x1ec   :  { %v207_v28 = vadd.f32 %v206_v27, %v143_v24  ;;  %v208_v29 = vpop.f32.mrb[2].mxu1 }
 0x1ed   :  { %213 = vst [vmem:[#allocation8] sm:$0xff] %v205_v26  ;;  %v209_v30 = vadd.f32 %v208_v29, %v139_v23  ;;  %v210_v31 = vpop.f32.mrb[3].mxu1 }
 0x1ee   :  { %215 = vst [vmem:[#allocation9] sm:$0xff] %v207_v28  ;;  %v211_v32 = vadd.f32 %v210_v31, %v143_v24 }
 0x1ef   :  { %214 = vst [vmem:[#allocation8 + $0x8] sm:$0xff] %v209_v30 }
 0x1f0   :  { %216 = vst [vmem:[#allocation9 + $0x8] sm:$0xff] %v211_v32 }
 0x1f1   :  { %363 = shalt.err (!%p360_p0)
}
 0x1f2   :  { %s364_s19 = scalar_lea.hbm %s541_s5, 256 }
 0x1f3   :  { %p365_p1 = scmp.ne.s32.totalorder %s541_s5, %s364_s19  ;;  %p368_p2 = scmp.lt.u32.totalorder %s364_s19, %s541_s5 }
 0x1f5   :  { %p370_p3 = pnand %p368_p2, %p365_p1 }
 0x1f7   :  { %373 = shalt.err (!%p370_p3)
}
 0x1f8   :  { %228 = dma.vmem_to_hbm [thread:$0]  %s223_s14, 256, %s541_s5, [#allocation4], %s408_s1, %s408_s1, %s409_s21  }
 0x1f9   :  { %s374_s27 = scalar_lea.vmem %s499_s16, 256  ;;  %p379_p5 = scmp.lt.s32.totalorder %s499_s16, %s499_s16 }
 0x1fa   :  { %p375_p4 = scmp.ne.s32.totalorder %s499_s16, %s374_s27  ;;  %p380_p6 = scmp.lt.s32.totalorder %s374_s27, %s374_s27 }
 0x1fc   :  { %p381_p7 = por %p380_p6, %p379_p5 }
 0x1fe   :  { %p382_p8 = pnand %p381_p7, %p375_p4 }
 0x200   :  { %385 = shalt.err (!%p382_p8)
}
 0x201   :  { %s386_s30 = scalar_lea.hbm %s542_s6, 256 }
 0x202   :  { %p387_p9 = scmp.ne.s32.totalorder %s542_s6, %s386_s30  ;;  %p390_p10 = scmp.lt.u32.totalorder %s386_s30, %s542_s6 }
 0x204   :  { %p392_p11 = pnand %p390_p10, %p387_p9 }
 0x206   :  { %395 = shalt.err (!%p392_p11)
}
 0x207   :  { %240 = dma.vmem_to_hbm [thread:$0]  %s499_s16, 256, %s542_s6, [#allocation10], %s408_s1, %s408_s1, %s409_s21  }
 0x208   :  { %400 = dma.done.wait [#allocation4], 256  }
 0x209   :  { %401 = vsyncadd [#allocation4], 4294967040 }
 0x20a   :  { %402 = dma.done.wait [#allocation10], 256  }
 0x20b   :  { %403 = vsyncadd [#allocation10], 4294967040 }
 0x20c   :  { %247 = vsyncpa [#allocation3], 1 }
 0x20d   :  { %248 = vsyncpa [#allocation6], 1 }
 0x20e   :  { %249 = vsyncpa [#allocation4], 1 }
 0x20f   :  { %250 = vsyncpa [#allocation10], 1 }

</bundles_post_ra>
